<compile_context>
chip_gen: v7x
topology: tpu7x:2x2x1
jax: 0.10.0
libtpu: 0.0.40
codegen_flags: <defaults>
</compile_context>

<pallas_src>
import functools

import jax
import jax.numpy as jnp
from jax.experimental import pallas as pl
from jax.experimental.pallas import tpu as pltpu


def _weighted_sum_kernel(w_ref, x_ref, o_ref):
    # w_ref: (L,)            f32 in SMEM, already normalized (w / sum(w))
    # x_ref: (1, L, tile_t, F) f32 in VMEM
    # o_ref: (1, tile_t, F)    f32 in VMEM
    L = x_ref.shape[1]
    acc = x_ref[0, 0] * w_ref[0]
    for l in range(1, L):                       # unrolled; L is small (24)
        acc = acc + x_ref[0, l] * w_ref[l]
    o_ref[0] = acc.astype(o_ref.dtype)


def _pick_tile_t(L, T, F, itemsize=4, block_budget_bytes=4 * 1024 * 1024):
    """Largest time-tile whose input block stays under the VMEM budget (multiple of 8)."""
    if T <= 8:
        return T
    per_row = L * F * itemsize
    t = max(1, block_budget_bytes // per_row)
    t = max(8, (t // 8) * 8)
    return min(t, T)


@functools.partial(jax.jit, static_argnames=("tile_t",))
def weighted_sum(x, weights, *, tile_t=None):
    """x: (B, L, T, F); weights: (L, 1) or (L,). Returns (B, T, F)."""
    B, L, T, F = x.shape
    w = weights.reshape(-1).astype(jnp.float32)
    assert w.shape[0] == L, "weights must have num_weight == x.shape[1]"

    # Hoisted prep (24 elements): normalize once instead of dividing B*T*F outputs
    # or re-summing per grid step inside the kernel.
    w_norm = w / jnp.sum(w)

    if tile_t is None:
        tile_t = _pick_tile_t(L, T, F, jnp.dtype(x.dtype).itemsize)

    grid = (B, pl.cdiv(T, tile_t))
    return pl.pallas_call(
        _weighted_sum_kernel,
        out_shape=jax.ShapeDtypeStruct((B, T, F), x.dtype),
        grid=grid,
        in_specs=[
            # normalized layer weights: resident in SMEM across the whole grid
            pl.BlockSpec(memory_space=pltpu.MemorySpace.SMEM),
            # input: one batch row, all layers, one time tile, full feature width
            pl.BlockSpec((1, L, tile_t, F), lambda b, t: (b, 0, t, 0)),
        ],
        out_specs=pl.BlockSpec((1, tile_t, F), lambda b, t: (b, t, 0)),
        compiler_params=pltpu.CompilerParams(
            dimension_semantics=("parallel", "parallel"),
        ),
    )(w_norm, x)


if __name__ == "__main__":
    key = jax.random.PRNGKey(0)
    k_x, k_w = jax.random.split(key)

    # Small shapes consistent with the module: 24 SSL layers; feature dim kept
    # lane-dense (128) so even the demo hits unmasked 128-wide stores.
    B, L, T, F = 2, 24, 16, 128
    x = jax.random.normal(k_x, (B, L, T, F), jnp.float32)
    weights = jax.random.uniform(k_w, (L, 1), jnp.float32)   # torch.rand((L, 1))

    y = weighted_sum(x, weights, tile_t=8)   # grid (2, 2): exercises the tiling
    jax.block_until_ready(y)

    # Plain-JAX reference implementing the same math as the PyTorch forward
    # (elementwise form to avoid TPU default-precision matmul in the reference).
    wn = (weights / jnp.sum(weights)).reshape(1, L, 1, 1)
    ref = jnp.sum(x * wn, axis=1)                            # (B, T, F)

    assert y.shape == (B, T, F)
    assert jnp.allclose(y, ref, atol=1e-4, rtol=1e-4), "mismatch vs reference"

    print("KERNEL_OK")
</pallas_src>

<mosaic_0001>
module attributes {stable_mosaic.version = 11 : i64} {
  func.func @_weighted_sum_kernel(%arg0: i32, %arg1: i32, %arg2: memref<24xf32, #tpu.memory_space<smem>>, %arg3: memref<1x24x8x128xf32, #tpu.memory_space<vmem>>, %arg4: memref<1x8x128xf32, #tpu.memory_space<vmem>>) attributes {dimension_semantics = [#tpu.dimension_semantics<parallel>, #tpu.dimension_semantics<parallel>], iteration_bounds = array<i64: 2, 2>, scalar_prefetch = 0 : i64, scratch_operands = 0 : i64, tpu.core_type = #tpu.core_type<tc>, window_params = [{transform_indices = @transform_0, window_bounds = array<i64: 24>}, {transform_indices = @transform_1, window_bounds = array<i64: 1, 24, 8, 128>}, {transform_indices = @transform_2, window_bounds = array<i64: 1, 8, 128>}]} {
    %c0 = arith.constant 0 : index
    %c0_0 = arith.constant 0 : index
    %c0_1 = arith.constant 0 : index
    %c0_2 = arith.constant 0 : index
    %0 = vector.load %arg3[%c0, %c0_0, %c0_1, %c0_2] : memref<1x24x8x128xf32, #tpu.memory_space<vmem>>, vector<1x1x8x128xf32>
    %1 = vector.shape_cast %0 : vector<1x1x8x128xf32> to vector<8x128xf32>
    %c0_3 = arith.constant 0 : index
    %2 = memref.load %arg2[%c0_3] : memref<24xf32, #tpu.memory_space<smem>>
    %3 = vector.broadcast %2 : f32 to vector<8x128xf32>
    %4 = arith.mulf %1, %3 : vector<8x128xf32>
    %c0_4 = arith.constant 0 : index
    %c1 = arith.constant 1 : index
    %c0_5 = arith.constant 0 : index
    %c0_6 = arith.constant 0 : index
    %5 = vector.load %arg3[%c0_4, %c1, %c0_5, %c0_6] : memref<1x24x8x128xf32, #tpu.memory_space<vmem>>, vector<1x1x8x128xf32>
    %6 = vector.shape_cast %5 : vector<1x1x8x128xf32> to vector<8x128xf32>
    %c1_7 = arith.constant 1 : index
    %7 = memref.load %arg2[%c1_7] : memref<24xf32, #tpu.memory_space<smem>>
    %8 = vector.broadcast %7 : f32 to vector<8x128xf32>
    %9 = arith.mulf %6, %8 : vector<8x128xf32>
    %10 = arith.addf %4, %9 : vector<8x128xf32>
    %c0_8 = arith.constant 0 : index
    %c2 = arith.constant 2 : index
    %c0_9 = arith.constant 0 : index
    %c0_10 = arith.constant 0 : index
    %11 = vector.load %arg3[%c0_8, %c2, %c0_9, %c0_10] : memref<1x24x8x128xf32, #tpu.memory_space<vmem>>, vector<1x1x8x128xf32>
    %12 = vector.shape_cast %11 : vector<1x1x8x128xf32> to vector<8x128xf32>
    %c2_11 = arith.constant 2 : index
    %13 = memref.load %arg2[%c2_11] : memref<24xf32, #tpu.memory_space<smem>>
    %14 = vector.broadcast %13 : f32 to vector<8x128xf32>
    %15 = arith.mulf %12, %14 : vector<8x128xf32>
    %16 = arith.addf %10, %15 : vector<8x128xf32>
    %c0_12 = arith.constant 0 : index
    %c3 = arith.constant 3 : index
    %c0_13 = arith.constant 0 : index
    %c0_14 = arith.constant 0 : index
    %17 = vector.load %arg3[%c0_12, %c3, %c0_13, %c0_14] : memref<1x24x8x128xf32, #tpu.memory_space<vmem>>, vector<1x1x8x128xf32>
    %18 = vector.shape_cast %17 : vector<1x1x8x128xf32> to vector<8x128xf32>
    %c3_15 = arith.constant 3 : index
    %19 = memref.load %arg2[%c3_15] : memref<24xf32, #tpu.memory_space<smem>>
    %20 = vector.broadcast %19 : f32 to vector<8x128xf32>
    %21 = arith.mulf %18, %20 : vector<8x128xf32>
    %22 = arith.addf %16, %21 : vector<8x128xf32>
    %c0_16 = arith.constant 0 : index
    %c4 = arith.constant 4 : index
    %c0_17 = arith.constant 0 : index
    %c0_18 = arith.constant 0 : index
    %23 = vector.load %arg3[%c0_16, %c4, %c0_17, %c0_18] : memref<1x24x8x128xf32, #tpu.memory_space<vmem>>, vector<1x1x8x128xf32>
    %24 = vector.shape_cast %23 : vector<1x1x8x128xf32> to vector<8x128xf32>
    %c4_19 = arith.constant 4 : index
    %25 = memref.load %arg2[%c4_19] : memref<24xf32, #tpu.memory_space<smem>>
    %26 = vector.broadcast %25 : f32 to vector<8x128xf32>
    %27 = arith.mulf %24, %26 : vector<8x128xf32>
    %28 = arith.addf %22, %27 : vector<8x128xf32>
    %c0_20 = arith.constant 0 : index
    %c5 = arith.constant 5 : index
    %c0_21 = arith.constant 0 : index
    %c0_22 = arith.constant 0 : index
    %29 = vector.load %arg3[%c0_20, %c5, %c0_21, %c0_22] : memref<1x24x8x128xf32, #tpu.memory_space<vmem>>, vector<1x1x8x128xf32>
    %30 = vector.shape_cast %29 : vector<1x1x8x128xf32> to vector<8x128xf32>
    %c5_23 = arith.constant 5 : index
    %31 = memref.load %arg2[%c5_23] : memref<24xf32, #tpu.memory_space<smem>>
    %32 = vector.broadcast %31 : f32 to vector<8x128xf32>
    %33 = arith.mulf %30, %32 : vector<8x128xf32>
    %34 = arith.addf %28, %33 : vector<8x128xf32>
    %c0_24 = arith.constant 0 : index
    %c6 = arith.constant 6 : index
    %c0_25 = arith.constant 0 : index
    %c0_26 = arith.constant 0 : index
    %35 = vector.load %arg3[%c0_24, %c6, %c0_25, %c0_26] : memref<1x24x8x128xf32, #tpu.memory_space<vmem>>, vector<1x1x8x128xf32>
    %36 = vector.shape_cast %35 : vector<1x1x8x128xf32> to vector<8x128xf32>
    %c6_27 = arith.constant 6 : index
    %37 = memref.load %arg2[%c6_27] : memref<24xf32, #tpu.memory_space<smem>>
    %38 = vector.broadcast %37 : f32 to vector<8x128xf32>
    %39 = arith.mulf %36, %38 : vector<8x128xf32>
    %40 = arith.addf %34, %39 : vector<8x128xf32>
    %c0_28 = arith.constant 0 : index
    %c7 = arith.constant 7 : index
    %c0_29 = arith.constant 0 : index
    %c0_30 = arith.constant 0 : index
    %41 = vector.load %arg3[%c0_28, %c7, %c0_29, %c0_30] : memref<1x24x8x128xf32, #tpu.memory_space<vmem>>, vector<1x1x8x128xf32>
    %42 = vector.shape_cast %41 : vector<1x1x8x128xf32> to vector<8x128xf32>
    %c7_31 = arith.constant 7 : index
    %43 = memref.load %arg2[%c7_31] : memref<24xf32, #tpu.memory_space<smem>>
    %44 = vector.broadcast %43 : f32 to vector<8x128xf32>
    %45 = arith.mulf %42, %44 : vector<8x128xf32>
    %46 = arith.addf %40, %45 : vector<8x128xf32>
    %c0_32 = arith.constant 0 : index
    %c8 = arith.constant 8 : index
    %c0_33 = arith.constant 0 : index
    %c0_34 = arith.constant 0 : index
    %47 = vector.load %arg3[%c0_32, %c8, %c0_33, %c0_34] : memref<1x24x8x128xf32, #tpu.memory_space<vmem>>, vector<1x1x8x128xf32>
    %48 = vector.shape_cast %47 : vector<1x1x8x128xf32> to vector<8x128xf32>
    %c8_35 = arith.constant 8 : index
    %49 = memref.load %arg2[%c8_35] : memref<24xf32, #tpu.memory_space<smem>>
    %50 = vector.broadcast %49 : f32 to vector<8x128xf32>
    %51 = arith.mulf %48, %50 : vector<8x128xf32>
    %52 = arith.addf %46, %51 : vector<8x128xf32>
    %c0_36 = arith.constant 0 : index
    %c9 = arith.constant 9 : index
    %c0_37 = arith.constant 0 : index
    %c0_38 = arith.constant 0 : index
    %53 = vector.load %arg3[%c0_36, %c9, %c0_37, %c0_38] : memref<1x24x8x128xf32, #tpu.memory_space<vmem>>, vector<1x1x8x128xf32>
    %54 = vector.shape_cast %53 : vector<1x1x8x128xf32> to vector<8x128xf32>
    %c9_39 = arith.constant 9 : index
    %55 = memref.load %arg2[%c9_39] : memref<24xf32, #tpu.memory_space<smem>>
    %56 = vector.broadcast %55 : f32 to vector<8x128xf32>
    %57 = arith.mulf %54, %56 : vector<8x128xf32>
    %58 = arith.addf %52, %57 : vector<8x128xf32>
    %c0_40 = arith.constant 0 : index
    %c10 = arith.constant 10 : index
    %c0_41 = arith.constant 0 : index
    %c0_42 = arith.constant 0 : index
    %59 = vector.load %arg3[%c0_40, %c10, %c0_41, %c0_42] : memref<1x24x8x128xf32, #tpu.memory_space<vmem>>, vector<1x1x8x128xf32>
    %60 = vector.shape_cast %59 : vector<1x1x8x128xf32> to vector<8x128xf32>
    %c10_43 = arith.constant 10 : index
    %61 = memref.load %arg2[%c10_43] : memref<24xf32, #tpu.memory_space<smem>>
    %62 = vector.broadcast %61 : f32 to vector<8x128xf32>
    %63 = arith.mulf %60, %62 : vector<8x128xf32>
    %64 = arith.addf %58, %63 : vector<8x128xf32>
    %c0_44 = arith.constant 0 : index
    %c11 = arith.constant 11 : index
    %c0_45 = arith.constant 0 : index
    %c0_46 = arith.constant 0 : index
    %65 = vector.load %arg3[%c0_44, %c11, %c0_45, %c0_46] : memref<1x24x8x128xf32, #tpu.memory_space<vmem>>, vector<1x1x8x128xf32>
    %66 = vector.shape_cast %65 : vector<1x1x8x128xf32> to vector<8x128xf32>
    %c11_47 = arith.constant 11 : index
    %67 = memref.load %arg2[%c11_47] : memref<24xf32, #tpu.memory_space<smem>>
    %68 = vector.broadcast %67 : f32 to vector<8x128xf32>
    %69 = arith.mulf %66, %68 : vector<8x128xf32>
    %70 = arith.addf %64, %69 : vector<8x128xf32>
    %c0_48 = arith.constant 0 : index
    %c12 = arith.constant 12 : index
    %c0_49 = arith.constant 0 : index
    %c0_50 = arith.constant 0 : index
    %71 = vector.load %arg3[%c0_48, %c12, %c0_49, %c0_50] : memref<1x24x8x128xf32, #tpu.memory_space<vmem>>, vector<1x1x8x128xf32>
    %72 = vector.shape_cast %71 : vector<1x1x8x128xf32> to vector<8x128xf32>
    %c12_51 = arith.constant 12 : index
    %73 = memref.load %arg2[%c12_51] : memref<24xf32, #tpu.memory_space<smem>>
    %74 = vector.broadcast %73 : f32 to vector<8x128xf32>
    %75 = arith.mulf %72, %74 : vector<8x128xf32>
    %76 = arith.addf %70, %75 : vector<8x128xf32>
    %c0_52 = arith.constant 0 : index
    %c13 = arith.constant 13 : index
    %c0_53 = arith.constant 0 : index
    %c0_54 = arith.constant 0 : index
    %77 = vector.load %arg3[%c0_52, %c13, %c0_53, %c0_54] : memref<1x24x8x128xf32, #tpu.memory_space<vmem>>, vector<1x1x8x128xf32>
    %78 = vector.shape_cast %77 : vector<1x1x8x128xf32> to vector<8x128xf32>
    %c13_55 = arith.constant 13 : index
    %79 = memref.load %arg2[%c13_55] : memref<24xf32, #tpu.memory_space<smem>>
    %80 = vector.broadcast %79 : f32 to vector<8x128xf32>
    %81 = arith.mulf %78, %80 : vector<8x128xf32>
    %82 = arith.addf %76, %81 : vector<8x128xf32>
    %c0_56 = arith.constant 0 : index
    %c14 = arith.constant 14 : index
    %c0_57 = arith.constant 0 : index
    %c0_58 = arith.constant 0 : index
    %83 = vector.load %arg3[%c0_56, %c14, %c0_57, %c0_58] : memref<1x24x8x128xf32, #tpu.memory_space<vmem>>, vector<1x1x8x128xf32>
    %84 = vector.shape_cast %83 : vector<1x1x8x128xf32> to vector<8x128xf32>
    %c14_59 = arith.constant 14 : index
    %85 = memref.load %arg2[%c14_59] : memref<24xf32, #tpu.memory_space<smem>>
    %86 = vector.broadcast %85 : f32 to vector<8x128xf32>
    %87 = arith.mulf %84, %86 : vector<8x128xf32>
    %88 = arith.addf %82, %87 : vector<8x128xf32>
    %c0_60 = arith.constant 0 : index
    %c15 = arith.constant 15 : index
    %c0_61 = arith.constant 0 : index
    %c0_62 = arith.constant 0 : index
    %89 = vector.load %arg3[%c0_60, %c15, %c0_61, %c0_62] : memref<1x24x8x128xf32, #tpu.memory_space<vmem>>, vector<1x1x8x128xf32>
    %90 = vector.shape_cast %89 : vector<1x1x8x128xf32> to vector<8x128xf32>
    %c15_63 = arith.constant 15 : index
    %91 = memref.load %arg2[%c15_63] : memref<24xf32, #tpu.memory_space<smem>>
    %92 = vector.broadcast %91 : f32 to vector<8x128xf32>
    %93 = arith.mulf %90, %92 : vector<8x128xf32>
    %94 = arith.addf %88, %93 : vector<8x128xf32>
    %c0_64 = arith.constant 0 : index
    %c16 = arith.constant 16 : index
    %c0_65 = arith.constant 0 : index
    %c0_66 = arith.constant 0 : index
    %95 = vector.load %arg3[%c0_64, %c16, %c0_65, %c0_66] : memref<1x24x8x128xf32, #tpu.memory_space<vmem>>, vector<1x1x8x128xf32>
    %96 = vector.shape_cast %95 : vector<1x1x8x128xf32> to vector<8x128xf32>
    %c16_67 = arith.constant 16 : index
    %97 = memref.load %arg2[%c16_67] : memref<24xf32, #tpu.memory_space<smem>>
    %98 = vector.broadcast %97 : f32 to vector<8x128xf32>
    %99 = arith.mulf %96, %98 : vector<8x128xf32>
    %100 = arith.addf %94, %99 : vector<8x128xf32>
    %c0_68 = arith.constant 0 : index
    %c17 = arith.constant 17 : index
    %c0_69 = arith.constant 0 : index
    %c0_70 = arith.constant 0 : index
    %101 = vector.load %arg3[%c0_68, %c17, %c0_69, %c0_70] : memref<1x24x8x128xf32, #tpu.memory_space<vmem>>, vector<1x1x8x128xf32>
    %102 = vector.shape_cast %101 : vector<1x1x8x128xf32> to vector<8x128xf32>
    %c17_71 = arith.constant 17 : index
    %103 = memref.load %arg2[%c17_71] : memref<24xf32, #tpu.memory_space<smem>>
    %104 = vector.broadcast %103 : f32 to vector<8x128xf32>
    %105 = arith.mulf %102, %104 : vector<8x128xf32>
    %106 = arith.addf %100, %105 : vector<8x128xf32>
    %c0_72 = arith.constant 0 : index
    %c18 = arith.constant 18 : index
    %c0_73 = arith.constant 0 : index
    %c0_74 = arith.constant 0 : index
    %107 = vector.load %arg3[%c0_72, %c18, %c0_73, %c0_74] : memref<1x24x8x128xf32, #tpu.memory_space<vmem>>, vector<1x1x8x128xf32>
    %108 = vector.shape_cast %107 : vector<1x1x8x128xf32> to vector<8x128xf32>
    %c18_75 = arith.constant 18 : index
    %109 = memref.load %arg2[%c18_75] : memref<24xf32, #tpu.memory_space<smem>>
    %110 = vector.broadcast %109 : f32 to vector<8x128xf32>
    %111 = arith.mulf %108, %110 : vector<8x128xf32>
    %112 = arith.addf %106, %111 : vector<8x128xf32>
    %c0_76 = arith.constant 0 : index
    %c19 = arith.constant 19 : index
    %c0_77 = arith.constant 0 : index
    %c0_78 = arith.constant 0 : index
    %113 = vector.load %arg3[%c0_76, %c19, %c0_77, %c0_78] : memref<1x24x8x128xf32, #tpu.memory_space<vmem>>, vector<1x1x8x128xf32>
    %114 = vector.shape_cast %113 : vector<1x1x8x128xf32> to vector<8x128xf32>
    %c19_79 = arith.constant 19 : index
    %115 = memref.load %arg2[%c19_79] : memref<24xf32, #tpu.memory_space<smem>>
    %116 = vector.broadcast %115 : f32 to vector<8x128xf32>
    %117 = arith.mulf %114, %116 : vector<8x128xf32>
    %118 = arith.addf %112, %117 : vector<8x128xf32>
    %c0_80 = arith.constant 0 : index
    %c20 = arith.constant 20 : index
    %c0_81 = arith.constant 0 : index
    %c0_82 = arith.constant 0 : index
    %119 = vector.load %arg3[%c0_80, %c20, %c0_81, %c0_82] : memref<1x24x8x128xf32, #tpu.memory_space<vmem>>, vector<1x1x8x128xf32>
    %120 = vector.shape_cast %119 : vector<1x1x8x128xf32> to vector<8x128xf32>
    %c20_83 = arith.constant 20 : index
    %121 = memref.load %arg2[%c20_83] : memref<24xf32, #tpu.memory_space<smem>>
    %122 = vector.broadcast %121 : f32 to vector<8x128xf32>
    %123 = arith.mulf %120, %122 : vector<8x128xf32>
    %124 = arith.addf %118, %123 : vector<8x128xf32>
    %c0_84 = arith.constant 0 : index
    %c21 = arith.constant 21 : index
    %c0_85 = arith.constant 0 : index
    %c0_86 = arith.constant 0 : index
    %125 = vector.load %arg3[%c0_84, %c21, %c0_85, %c0_86] : memref<1x24x8x128xf32, #tpu.memory_space<vmem>>, vector<1x1x8x128xf32>
    %126 = vector.shape_cast %125 : vector<1x1x8x128xf32> to vector<8x128xf32>
    %c21_87 = arith.constant 21 : index
    %127 = memref.load %arg2[%c21_87] : memref<24xf32, #tpu.memory_space<smem>>
    %128 = vector.broadcast %127 : f32 to vector<8x128xf32>
    %129 = arith.mulf %126, %128 : vector<8x128xf32>
    %130 = arith.addf %124, %129 : vector<8x128xf32>
    %c0_88 = arith.constant 0 : index
    %c22 = arith.constant 22 : index
    %c0_89 = arith.constant 0 : index
    %c0_90 = arith.constant 0 : index
    %131 = vector.load %arg3[%c0_88, %c22, %c0_89, %c0_90] : memref<1x24x8x128xf32, #tpu.memory_space<vmem>>, vector<1x1x8x128xf32>
    %132 = vector.shape_cast %131 : vector<1x1x8x128xf32> to vector<8x128xf32>
    %c22_91 = arith.constant 22 : index
    %133 = memref.load %arg2[%c22_91] : memref<24xf32, #tpu.memory_space<smem>>
    %134 = vector.broadcast %133 : f32 to vector<8x128xf32>
    %135 = arith.mulf %132, %134 : vector<8x128xf32>
    %136 = arith.addf %130, %135 : vector<8x128xf32>
    %c0_92 = arith.constant 0 : index
    %c23 = arith.constant 23 : index
    %c0_93 = arith.constant 0 : index
    %c0_94 = arith.constant 0 : index
    %137 = vector.load %arg3[%c0_92, %c23, %c0_93, %c0_94] : memref<1x24x8x128xf32, #tpu.memory_space<vmem>>, vector<1x1x8x128xf32>
    %138 = vector.shape_cast %137 : vector<1x1x8x128xf32> to vector<8x128xf32>
    %c23_95 = arith.constant 23 : index
    %139 = memref.load %arg2[%c23_95] : memref<24xf32, #tpu.memory_space<smem>>
    %140 = vector.broadcast %139 : f32 to vector<8x128xf32>
    %141 = arith.mulf %138, %140 : vector<8x128xf32>
    %142 = arith.addf %136, %141 : vector<8x128xf32>
    %c0_96 = arith.constant 0 : index
    %c0_97 = arith.constant 0 : index
    %c0_98 = arith.constant 0 : index
    %143 = vector.load %arg4[%c0_96, %c0_97, %c0_98] : memref<1x8x128xf32, #tpu.memory_space<vmem>>, vector<1x8x128xf32>
    %144 = vector.shape_cast %143 : vector<1x8x128xf32> to vector<8x128xf32>
    %145 = vector.shape_cast %142 : vector<8x128xf32> to vector<1x8x128xf32>
    tpu.vector_store %arg4[%c0_96, %c0_97, %c0_98], %145 {strides = array<i32>} : memref<1x8x128xf32, #tpu.memory_space<vmem>>, vector<1x8x128xf32>,
    return
  }
  func.func @transform_0(%arg0: i32, %arg1: i32) -> i32 {
    %c0_i32 = arith.constant 0 : i32
    %c0_i32_0 = arith.constant 0 : i32
    return %c0_i32 : i32
  }
  func.func @transform_1(%arg0: i32, %arg1: i32) -> (i32, i32, i32, i32) {
    %c0_i32 = arith.constant 0 : i32
    %c0_i32_0 = arith.constant 0 : i32
    %c0_i32_1 = arith.constant 0 : i32
    return %arg0, %c0_i32, %arg1, %c0_i32_0 : i32, i32, i32, i32
  }
  func.func @transform_2(%arg0: i32, %arg1: i32) -> (i32, i32, i32) {
    %c0_i32 = arith.constant 0 : i32
    %c0_i32_0 = arith.constant 0 : i32
    return %arg0, %arg1, %c0_i32 : i32, i32, i32
  }
}

</mosaic_0001>

<bundles_post_ra>
// kernel: weighted_sum.1
= control target key start
LH: loop header
LB: loop body
LE: loop exit
PB: predicated region body
PF: predicated region fallthrough
CT: control target
= control target key end

     0   :  { %s1013_s0 = inlined_call_operand.vmem [shape: f32[24], index: 0, kind: input, shape index: {}]   ;;  %s1014_s1 = inlined_call_operand.hbm [shape: f32[2,24,16,128], index: 1, kind: input, shape index: {}]   ;;  %s1015_s2 = inlined_call_operand.hbm [shape: f32[2,16,128], index: 2, kind: output, shape index: {}]  }
   0x1   :  { %1021 = sst [smem:[#allocation13_spill]] %s1013_s0 }
   0x2   :  { %7 = vsyncpa [#allocation5], 0 }
   0x3   :  { %8 = vsyncpa [#allocation3], 0 }
   0x4   :  { %10 = vsyncpa [#allocation3 + $0x1], 0 }
   0x5   :  { %11 = vsyncpa [#allocation4], 0 }
   0x6   :  { %13 = vsyncpa [#allocation4 + $0x1], 0  ;;  %s774_s9 = smov 0   ;;  %s776_s10 = smov 0  }
   0x7   :  { %s778_s11 = smov 0   ;;  %s780_s12 = smov 0  }
   0x8   :  { %s782_s13 = smov 0   ;;  %s784_s14 = smov 0  }
   0x9   :  { %s786_s15 = smov 0   ;;  %s788_s16 = smov 0  }
   0xa LB: > { %s449_s17 = sadd.s32 4294967295, %s751_s16   ;;  %s450_s18 = sadd.s32 4294967294, %s751_s16   ;;  %s751_s16 = sphi %s788_s16, %s19_s16   ;;  %s747_s15 = sphi %s786_s15, %s1044_s15   ;;  %s743_s14 = sphi %s784_s14, %s1043_s14   ;;  %s739_s13 = sphi %s782_s13, %s1042_s13   ;;  %s735_s12 = sphi %s780_s12, %s1041_s12   ;;  %s731_s11 = sphi %s778_s11, %s1040_s11   ;;  %s727_s10 = sphi %s776_s10, %s1039_s10   ;;  %s723_s9 = sphi %s774_s9, %s1038_s9  }
   0xb   : > { %p68_p0 = scmp.ne.s32.totalorder %s731_s11, %s727_s10  ;;  %p69_p1 = scmp.eq.s32.totalorder %s751_s16, 0 }
   0xc   : > { %p74_p2 = scmp.ne.s32.totalorder %s727_s10, %s723_s9  ;;  %p822_p3 = scmp.eq.s32.totalorder %s449_s17, 0 }
   0xd   : > { %p100_p4 = scmp.eq.s32.totalorder %s449_s17, 3  ;;  %p70_p5 = por %p69_p1, %p68_p0 }
   0xe   : > { %p106_p6 = scmp.eq.s32.totalorder %s450_s18, 3  ;;  %p828_p7 = por %p822_p3, %p74_p2 }
   0xf   : > { %p832_p8 = por %p100_p4, %p68_p0  ;;  %p451_p10 = scmp.ge.s32.totalorder %s751_s16, 1 }
  0x10   : > { %s1023_s21 = scalar_select %p828_p7, 1, 0 }
  0x11   : > { %s1024_s22 = scalar_select %p832_p8, 1, 0 }
  0x12   : > { %p836_p9 = por %p106_p6, %p74_p2  ;;  %p113_p11 = scmp.lt.s32.totalorder %s751_s16, 5 }
  0x13   : > { %s1026_s0 = sld [smem:[#allocation13_spill]]  ;;  %p533_p13 = scmp.lt.s32.totalorder %s751_s16, 4 }
  0x14   : > { %s1025_s23 = scalar_select %p836_p9, 1, 0 }
  0x15   : > { %p845_p12 = pnand %p451_p10, %p113_p11  ;;  %p852_p1 = pnand %p533_p13, %p70_p5 }
  0x16   : > { %s28_s29 = sadd.s32 1, %s743_s14 }
  0x17   : > { %s1027_s27 = scalar_select %p845_p12, 1, 0 }
  0x18   : > { %p520_p0 = pneg %p845_p12 }
  0x19   : > { %s126_s26 = sshll.u32 %s1026_s0, 4  ;;  %s127_s26 = int_to_ptr.vmem [resolvable:$true] %s126_s26 }
  0x1a   : > { %p521_p2 = pnand %p520_p0, %p822_p3  ;;  %s604_s30 = scalar_lea.vmem %s127_s26, 16 }
  0x1b   : > { %p605_p4 = scmp.ne.s32.totalorder %s127_s26, %s604_s30  ;;  %p612_p11 = scmp.lt.s32.totalorder %s127_s26, %s127_s26 }
  0x1c   : > { %p606_p6 = pneg %p521_p2  ;;  %p613_p8 = scmp.lt.s32.totalorder %s604_s30, %s604_s30 }
  0x1e   : > { %p607_p9 = pnand %p606_p6, %p605_p4  ;;  %p614_p7 = por %p613_p8, %p612_p11 }
  0x20   : > { %p608_p10 = pneg %p607_p9 }
  0x22   : > { %p615_p12 = pnand %p614_p7, %p608_p10 }
  0x24   : > { %618 = shalt.err (!%p615_p12)
}
  0x25   : > { %s753_s3 = smov [#allocation2]   ;;  %p29_p5 = scmp.ge.s32.totalorder %s28_s29, 2 }
  0x26   : > { %523 = dma.vmem_to_smem (!%p521_p2), %s127_s26, 16, %s753_s3, [#allocation5]  }
  0x27   : > { %s31_s4 = sadd.s32 1, %s747_s15  ;;  %s137_s5 = sand.u32 1, %s731_s11  }
  0x28   : > { %s510_s6 = smul.u32 48, %s747_s15  ;;  %s1046_s29 = smov (%p29_p5, %s28_s29), 0 }
  0x29   : > { %1029 = sst [smem:[#allocation11_spill]] %s1046_s29  ;;  %s1048_s4 = smov (!%p29_p5, %s31_s4), %s747_s15 }
  0x2a   : > { %s57_s7 = ssub.s32 %s743_s14, %s1046_s29  ;;  %p33_p7 = scmp.ge.s32.totalorder %s1048_s4, 2 }
  0x2b   : > { %s509_s8 = smul.u32 192, %s137_s5  ;;  %s146_s17 = sadd.s32 %s743_s14, %s510_s6 }
  0x2c   : > { %s1050_s4 = smov (%p33_p7, %s1048_s4), 0  ;;  %s454_s18 = sshll.u32 %s146_s17, 7 }
  0x2d   : > { %1030 = sst [smem:[#allocation12_spill]] %s1050_s4  ;;  %s56_s24 = ssub.s32 %s747_s15, %s1050_s4 }
  0x2e   : > { %s875_s30 = scalar_lea.hbm %s1014_s1, %s454_s18  ;;  %s58_s3 = sor.u32 %s57_s7, %s56_s24 }
  0x2f   : > { %s141_s19 = scalar_lea.vmem [#allocation6], %s509_s8  ;;  %p59_p8 = scmp.eq.s32.totalorder %s58_s3, 0 }
  0x30   : > { %s149_s0 = sshll.u32 %s141_s19, 4  ;;  %s1031_s6 = sadd.s32 1, %s731_s11  ;;  %s877_s0 = int_to_ptr.vmem [resolvable:$true] %s149_s0 }
  0x31   : > { %s882_s29 = scalar_select %p59_p8, %s731_s11, %s1031_s6  }
  0x32   : > { %s884_s17 = scalar_lea.sflag [#allocation3], %s137_s5  ;;  %s619_s4 = scalar_lea.hbm %s875_s30, 3072 }
  0x33   : > { %p620_p9 = scmp.ne.s32.totalorder %s875_s30, %s619_s4  ;;  %p621_p12 = pneg %p852_p1 }
  0x34   : > { %s624_s19 = scalar_lea.hbm %s1014_s1, 12288  ;;  %p625_p2 = scmp.lt.u32.totalorder %s875_s30, %s1014_s1 }
  0x35   : > { %p622_p13 = pnand %p621_p12, %p620_p9  ;;  %p626_p4 = scmp.lt.u32.totalorder %s624_s19, %s619_s4 }
  0x36   : > { %p628_p10 = scmp.lt.u32.totalorder %s619_s4, %s875_s30 }
  0x37   : > { %p623_p0 = pneg %p622_p13  ;;  %p627_p6 = por %p626_p4, %p625_p2 }
  0x39   : > { %p629_p11 = por %p628_p10, %p627_p6 }
  0x3b   : > { %p630_p5 = pnand %p629_p11, %p623_p0 }
  0x3d   : > { %633 = shalt.err (!%p630_p5)
}
  0x3e   : > { %s634_s5 = scalar_lea.vmem %s877_s0, 3072  ;;  %s754_s25 = smov [#allocation6]  }
  0x3f   : > { %p635_p7 = scmp.ne.s32.totalorder %s877_s0, %s634_s5  ;;  %s639_s26 = sshll.u32 %s754_s25, 4  ;;  %s640_s26 = int_to_ptr.vmem [resolvable:$false] %s639_s26 }
  0x40   : > { %s641_s3 = scalar_lea.vmem %s640_s26, 6144  ;;  %p642_p13 = scmp.lt.s32.totalorder %s877_s0, %s640_s26 }
  0x41   : > { %p637_p8 = pnand %p635_p7, %p621_p12  ;;  %p643_p2 = scmp.lt.s32.totalorder %s641_s3, %s634_s5 }
  0x43   : > { %p638_p9 = pneg %p637_p8  ;;  %p644_p4 = por %p643_p2, %p642_p13 }
  0x45   : > { %p645_p6 = pnand %p644_p4, %p638_p9 }
  0x47   : > { %648 = shalt.err (!%p645_p6)
}
  0x48   : > { %s755_s4 = smov 256   ;;  %s756_s6 = smov 128  }
  0x49   : > { %s757_s7 = smov 8   ;;  %p1032_p12 = scmp.ne.s32.totalorder %s1027_s27, 0 }
  0x4a   : > { %527 = dma.hbm_to_vmem [thread:$0]  (!%p852_p1), %s875_s30, 3072, %s877_s0, %s884_s17, %s755_s4, %s756_s6, %s757_s7  }
  0x4b   : > { %161 = sbr.rel (%p1032_p12) target bundleno = 159 (0x9f), region = 28 }
  0x52   : > { %710 = dma.done.wait (%p822_p3), [#allocation5], 16  }
  0x53   : > { %712 = vsyncadd (%p822_p3), [#allocation5], 4294967280  ;;  %s919_s18 = sand.u32 1, %s727_s10   ;;  %p1033_p1 = scmp.ne.s32.totalorder %s1023_s21, 0 }
  0x54   : > { %s511_s19 = smul.u32 192, %s919_s18  ;;  %s168_s8 = scalar_lea.sflag [#allocation3], %s919_s18 }
  0x56   : > { %s923_s24 = scalar_lea.vmem [#allocation6], %s511_s19 }
  0x57   : > { %714 = dma.done.wait (%p1033_p1), %s168_s8, 3072  }
  0x58   : > { %716 = vsyncadd (%p1033_p1), %s168_s8, 4294964224 }
  0x59   : > { %176 = sfence }
  0x5a   : > { %s194_s0 = sld [smem:[#allocation2]]  ;;  %s459_s20 = sld [smem:[#allocation2 + $0x1]]  ;;  %v193_v0 = vld [vmem:[%s923_s24] sm:$0xff]  ;;  %v458_v1 = vld [vmem:[%s923_s24 + $0x8] sm:$0xff]  ;;  %v460_v3 = vld [vmem:[%s923_s24 + $0x10] sm:$0xff] }
  0x5b   : > { %s461_s27 = sld [smem:[#allocation2 + $0x2]]  ;;  %s463_s28 = sld [smem:[#allocation2 + $0x3]]  ;;  %v462_v6 = vld [vmem:[%s923_s24 + $0x18] sm:$0xff]  ;;  %v464_v11 = vld [vmem:[%s923_s24 + $0x20] sm:$0xff]  ;;  %v466_v15 = vld [vmem:[%s923_s24 + $0x28] sm:$0xff] }
  0x5c   : > { %s465_s30 = sld [smem:[#allocation2 + $0x4]]  ;;  %s467_s17 = sld [smem:[#allocation2 + $0x5]]  ;;  %v468_v19 = vld [vmem:[%s923_s24 + $0x30] sm:$0xff]  ;;  %v470_v23 = vld [vmem:[%s923_s24 + $0x38] sm:$0xff]  ;;  %v472_v27 = vld [vmem:[%s923_s24 + $0x40] sm:$0xff] }
  0x5d   : > { %s469_s5 = sld [smem:[#allocation2 + $0x6]]  ;;  %s471_s21 = sld [smem:[#allocation2 + $0x7]]  ;;  %v474_v31 = vld [vmem:[%s923_s24 + $0x48] sm:$0xff]  ;;  %v476_v35 = vld [vmem:[%s923_s24 + $0x50] sm:$0xff]  ;;  %v478_v39 = vld [vmem:[%s923_s24 + $0x58] sm:$0xff] }
  0x5e   : > { %s473_s25 = sld [smem:[#allocation2 + $0x8]]  ;;  %s475_s26 = sld [smem:[#allocation2 + $0x9]]  ;;  %v480_v43 = vld [vmem:[%s923_s24 + $0x60] sm:$0xff]  ;;  %v482_v47 = vld [vmem:[%s923_s24 + $0x68] sm:$0xff]  ;;  %v484_v51 = vld [vmem:[%s923_s24 + $0x70] sm:$0xff] }
  0x5f   : > { %s477_s3 = sld [smem:[#allocation2 + $0xa]]  ;;  %s479_s4 = sld [smem:[#allocation2 + $0xb]]  ;;  %v486_v55 = vld [vmem:[%s923_s24 + $0x78] sm:$0xff]  ;;  %v488_v59 = vld [vmem:[%s923_s24 + $0x80] sm:$0xff]  ;;  %v490_v63 = vld [vmem:[%s923_s24 + $0x88] sm:$0xff] }
  0x60   : > { %v195_v2 = vstv %s194_s0  ;;  %v200_v5 = vstv %s459_s20  ;;  %s481_s6 = sld [smem:[#allocation2 + $0xc]]  ;;  %s483_s7 = sld [smem:[#allocation2 + $0xd]] }
  0x61   : > { %v196_v4 = vmul.f32 %v195_v2, %v193_v0  ;;  %v201_v7 = vmul.f32 %v458_v1, %v200_v5  ;;  %v206_v8 = vstv %s461_s27  ;;  %v212_v9 = vstv %s463_s28  ;;  %s485_s19 = sld [smem:[#allocation2 + $0xe]]  ;;  %s487_s8 = sld [smem:[#allocation2 + $0xf]] }
  0x62   : > { %v207_v10 = vmul.f32 %v460_v3, %v206_v8  ;;  %v218_v12 = vstv %s465_s30  ;;  %v213_v14 = vmul.f32 %v462_v6, %v212_v9  ;;  %v224_v16 = vstv %s467_s17  ;;  %s489_s0 = sld [smem:[#allocation2 + $0x10]]  ;;  %s491_s20 = sld [smem:[#allocation2 + $0x11]]  ;;  %v492_v3 = vld [vmem:[%s923_s24 + $0x90] sm:$0xff] }
  0x63   : > { %v202_v13 = vadd.f32 %v201_v7, %v196_v4  ;;  %v219_v18 = vmul.f32 %v464_v11, %v218_v12  ;;  %v230_v20 = vstv %s469_s5  ;;  %v225_v22 = vmul.f32 %v466_v15, %v224_v16  ;;  %s493_s27 = sld [smem:[#allocation2 + $0x12]]  ;;  %s495_s28 = sld [smem:[#allocation2 + $0x13]]  ;;  %v494_v7 = vld [vmem:[%s923_s24 + $0x98] sm:$0xff]  ;;  %v496_v11 = vld [vmem:[%s923_s24 + $0xa0] sm:$0xff]  ;;  %v498_v15 = vld [vmem:[%s923_s24 + $0xa8] sm:$0xff] }
  0x64   : > { %v236_v24 = vstv %s471_s21  ;;  %v231_v26 = vmul.f32 %v468_v19, %v230_v20  ;;  %v242_v28 = vstv %s473_s25  ;;  %v248_v32 = vstv %s475_s26  ;;  %s497_s30 = sld [smem:[#allocation2 + $0x14]]  ;;  %s499_s17 = sld [smem:[#allocation2 + $0x15]]  ;;  %v500_v19 = vld [vmem:[%s923_s24 + $0xb0] sm:$0xff] }
  0x65   : > { %v208_v17 = vadd.f32 %v207_v10, %v202_v13  ;;  %v237_v30 = vmul.f32 %v470_v23, %v236_v24  ;;  %v243_v34 = vmul.f32 %v472_v27, %v242_v28  ;;  %v254_v36 = vstv %s477_s3  ;;  %s501_s5 = sld [smem:[#allocation2 + $0x16]]  ;;  %s503_s21 = sld [smem:[#allocation2 + $0x17]]  ;;  %v502_v23 = vld [vmem:[%s923_s24 + $0xb8] sm:$0xff] }
  0x66   : > { %v249_v38 = vmul.f32 %v474_v31, %v248_v32  ;;  %v260_v40 = vstv %s479_s4  ;;  %v255_v42 = vmul.f32 %v476_v35, %v254_v36  ;;  %v266_v44 = vstv %s481_s6  ;;  %s457_s25 = sshll.u32 %s919_s18, 3  ;;  %s505_s26 = sshll.u32 %s739_s13, 1 }
  0x67   : > { %v214_v21 = vadd.f32 %v213_v14, %v208_v17  ;;  %v261_v46 = vmul.f32 %v478_v39, %v260_v40  ;;  %v272_v48 = vstv %s483_s7  ;;  %v267_v50 = vmul.f32 %v480_v43, %v266_v44  ;;  %s348_s3 = sadd.s32 %s735_s12, %s505_s26  ;;  %s192_s6 = scalar_lea.vmem [#allocation7], %s457_s25 }
  0x68   : > { %v278_v52 = vstv %s485_s19  ;;  %v273_v54 = vmul.f32 %v482_v47, %v272_v48  ;;  %v284_v56 = vstv %s487_s8  ;;  %v290_v60 = vstv %s489_s0  ;;  %s506_s4 = sshll.u32 %s348_s3, 7  ;;  %s352_s7 = sshll.u32 %s192_s6, 4  ;;  %s961_s7 = int_to_ptr.vmem [resolvable:$true] %s352_s7 }
  0x69   : > { %v220_v25 = vadd.f32 %v219_v18, %v214_v21  ;;  %v279_v58 = vmul.f32 %v484_v51, %v278_v52  ;;  %v285_v62 = vmul.f32 %v486_v55, %v284_v56  ;;  %v296_v0 = vstv %s491_s20  ;;  %s959_s13 = scalar_lea.hbm %s1015_s2, %s506_s4  ;;  %s337_s24 = scalar_lea.sflag [#allocation4], %s919_s18 }
  0x6a   : > { %v291_v2 = vmul.f32 %v488_v59, %v290_v60  ;;  %v302_v4 = vstv %s493_s27  ;;  %v297_v6 = vmul.f32 %v490_v63, %v296_v0  ;;  %v308_v8 = vstv %s495_s28  ;;  %s649_s12 = scalar_lea.vmem %s961_s7, 128  ;;  %p1034_p0 = scmp.ne.s32.totalorder %s1024_s22, 0 }
  0x6b   : > { %v226_v29 = vadd.f32 %v225_v22, %v220_v25  ;;  %v303_v10 = vmul.f32 %v492_v3, %v302_v4  ;;  %v314_v12 = vstv %s497_s30  ;;  %v309_v14 = vmul.f32 %v494_v7, %v308_v8  ;;  %p650_p3 = scmp.ne.s32.totalorder %s961_s7, %s649_s12  ;;  %s758_s0 = smov [#allocation7]  }
  0x6c   : > { %v320_v16 = vstv %s499_s17  ;;  %v315_v18 = vmul.f32 %v496_v11, %v314_v12  ;;  %v326_v20 = vstv %s501_s5  ;;  %v332_v24 = vstv %s503_s21  ;;  %s653_s20 = sshll.u32 %s758_s0, 4  ;;  %s654_s20 = int_to_ptr.vmem [resolvable:$false] %s653_s20 }
  0x6d   : > { %v232_v33 = vadd.f32 %v231_v26, %v226_v29  ;;  %v321_v22 = vmul.f32 %v498_v15, %v320_v16  ;;  %v327_v26 = vmul.f32 %v500_v19, %v326_v20  ;;  %v333_v28 = vmul.f32 %v502_v23, %v332_v24  ;;  %p651_p10 = pnand %p650_p3, %p1034_p0  ;;  %s655_s27 = scalar_lea.vmem %s654_s20, 256 }
  0x6e   : > { %p656_p5 = scmp.lt.s32.totalorder %s961_s7, %s654_s20  ;;  %p657_p7 = scmp.lt.s32.totalorder %s655_s27, %s649_s12 }
  0x6f   : > { %v238_v37 = vadd.f32 %v237_v30, %v232_v33  ;;  %p652_p11 = pneg %p651_p10 }
  0x70   : > { %p658_p8 = por %p657_p7, %p656_p5 }
  0x71   : > { %v244_v41 = vadd.f32 %v243_v34, %v238_v37 }
  0x72   : > { %p659_p9 = pnand %p658_p8, %p652_p11 }
  0x73   : > { %v250_v45 = vadd.f32 %v249_v38, %v244_v41 }
  0x75   : > { %v256_v49 = vadd.f32 %v255_v42, %v250_v45 }
  0x77   : > { %v262_v53 = vadd.f32 %v261_v46, %v256_v49 }
  0x79   : > { %v268_v57 = vadd.f32 %v267_v50, %v262_v53 }
  0x7b   : > { %v274_v61 = vadd.f32 %v273_v54, %v268_v57 }
  0x7d   : > { %v280_v1 = vadd.f32 %v279_v58, %v274_v61 }
  0x7f   : > { %v286_v5 = vadd.f32 %v285_v62, %v280_v1 }
  0x81   : > { %v292_v9 = vadd.f32 %v291_v2, %v286_v5 }
  0x83   : > { %v298_v13 = vadd.f32 %v297_v6, %v292_v9 }
  0x85   : > { %v304_v17 = vadd.f32 %v303_v10, %v298_v13 }
  0x87   : > { %v310_v21 = vadd.f32 %v309_v14, %v304_v17 }
  0x89   : > { %v316_v25 = vadd.f32 %v315_v18, %v310_v21 }
  0x8b   : > { %v322_v27 = vadd.f32 %v321_v22, %v316_v25 }
  0x8d   : > { %v328_v29 = vadd.f32 %v327_v26, %v322_v27 }
  0x8f   : > { %v334_v30 = vadd.f32 %v333_v28, %v328_v29 }
  0x91   : > { %335 = vst [vmem:[%s192_s6] sm:$0xff] %v334_v30 }
  0x92   : > { %662 = shalt.err (!%p659_p9)
}
  0x93   : > { %s663_s18 = scalar_lea.hbm %s959_s13, 128  ;;  %s667_s17 = scalar_lea.hbm %s1015_s2, 512 }
  0x94   : > { %p664_p13 = scmp.ne.s32.totalorder %s959_s13, %s663_s18  ;;  %p668_p6 = scmp.lt.u32.totalorder %s959_s13, %s1015_s2 }
  0x95   : > { %p669_p12 = scmp.lt.u32.totalorder %s667_s17, %s663_s18  ;;  %p671_p3 = scmp.lt.u32.totalorder %s663_s18, %s959_s13 }
  0x96   : > { %p665_p2 = pnand %p664_p13, %p1034_p0 }
  0x97   : > { %p670_p1 = por %p669_p12, %p668_p6 }
  0x98   : > { %p666_p4 = pneg %p665_p2 }
  0x99   : > { %p672_p10 = por %p671_p3, %p670_p1 }
  0x9b   : > { %p673_p11 = pnand %p672_p10, %p666_p4 }
  0x9d   : > { %676 = shalt.err (!%p673_p11)
}
  0x9e   : > { %518 = dma.vmem_to_hbm [thread:$0]  (%p1034_p0), %s961_s7, 128, %s959_s13, %s337_s24  }
  0x9f PF: > { %p535_p5 = scmp.ge.s32.totalorder %s751_s16, 2  ;;  %s364_s25 = sand.u32 1, %s723_s9  }
  0xa0   : > { %p1035_p7 = scmp.ne.s32.totalorder %s1025_s23, 0  ;;  %s365_s26 = scalar_lea.sflag [#allocation4], %s364_s25 }
  0xa2   : > { %p529_p8 = pnand %p535_p5, %p1035_p7 }
  0xa4   : > { %718 = dma.done.wait (!%p529_p8), %s365_s26, 128  }
  0xa5   : > { %720 = vsyncadd (!%p529_p8), %s365_s26, 4294967168  ;;  %s19_s16 = sadd.s32 1, %s751_s16   ;;  %s1036_s22 = sld [smem:[#allocation11_spill]] }
  0xa6   : > { %p16_p9 = scmp.ge.s32.totalorder %s19_s16, 6   ;;  %s1037_s3 = sld [smem:[#allocation12_spill]] }
  0xa7   : > { %s1038_s9 = smov %s727_s10  ;;  %s1039_s10 = smov %s731_s11 }
  0xa8   : > { %s1040_s11 = smov %s882_s29  ;;  %s1041_s12 = smov %s743_s14 }
  0xa9   : > { %s1042_s13 = smov %s747_s15  ;;  %18 = sbr.rel (!%p16_p9) target bundleno = 10 (0xa), region = 101 }
  0xab   : > { %s1043_s14 = smov %s1036_s22 }
  0xac   : > { %s1044_s15 = smov %s1037_s3 }
  0xb0   :  { %370 = vsyncpa [#allocation3], 1 }
  0xb1   :  { %372 = vsyncpa [#allocation3 + $0x1], 1 }
  0xb2   :  { %373 = vsyncpa [#allocation4], 1 }
  0xb3   :  { %375 = vsyncpa [#allocation4 + $0x1], 1 }
  0xb4   :  { %376 = vsyncpa [#allocation5], 1 }
  0xb5   :  { %378 = vsyncpa [#allocation5 + $0x1], 1 }

</bundles_post_ra>
